<compile_context>
chip_gen: v6e
topology: v6e:2x2x1
jax: 0.10.0
libtpu: 0.0.40
codegen_flags: <defaults>
</compile_context>

<pallas_src>
import math

import jax
import jax.numpy as jnp
from jax.experimental import pallas as pl
from jax.experimental.pallas import tpu as pltpu


def _locked_dropout_kernel(mask_ref, x_ref, o_ref):
    # mask block has size 1 along the locked axis -> broadcast multiply.
    # Multiply in f32 so bf16/f16 inputs don't pick up scale-rounding bias.
    o_ref[...] = (x_ref[...].astype(jnp.float32) * mask_ref[...]).astype(o_ref.dtype)


def _sublane_multiple(itemsize: int) -> int:
    # 4-byte: 8 sublanes; bf16/f16: 16; int8/fp8: 32 (dtype-native packing).
    return max(8, 32 // itemsize)


def _pick_block(shape, itemsize, sublane_mult, target_bytes):
    """Block shape for `shape` (rank >= 2): lane dim full-extent or a multiple
    of 128 (capped at 2048), sublane dim full-extent or a multiple of the
    dtype-native sublane count, leading dims sized to the byte budget."""
    r = len(shape)
    block = [1] * r

    lane = shape[-1]
    block[-1] = lane if lane <= 4096 else 2048            # multiple of 128 when tiled

    row_bytes = block[-1] * itemsize
    budget_rows = max(1, target_bytes // row_bytes)
    sub = shape[-2]
    if sub <= budget_rows:
        block[-2] = sub                                    # full extent
    else:
        block[-2] = min(sub, max(sublane_mult,
                                 (budget_rows // sublane_mult) * sublane_mult))

    cur_bytes = block[-1] * block[-2] * itemsize
    for ax in range(r - 3, -1, -1):                        # grow leading axes to budget
        rem = max(1, target_bytes // cur_bytes)
        block[ax] = int(min(shape[ax], rem))
        cur_bytes *= block[ax]
    return block


def _ensure_multi_step(shape, block, sublane_mult):
    """Split the block so the grid has >= 2 steps when cheaply possible
    (keeps v7x's second TensorCore busy)."""
    steps = 1
    for s, b in zip(shape, block):
        steps *= pl.cdiv(s, b)
    if steps >= 2:
        return block
    block = list(block)
    r = len(shape)
    for ax in range(r - 3, -1, -1):                        # leading axes: no tiling rule
        if shape[ax] >= 2:
            block[ax] = pl.cdiv(shape[ax], 2)
            return block
    if shape[-2] >= 2 * sublane_mult:                      # sublane axis
        block[-2] = max(sublane_mult,
                        ((shape[-2] // 2) // sublane_mult) * sublane_mult)
        return block
    if shape[-1] >= 2 * 128:                               # lane axis
        block[-1] = max(128, ((shape[-1] // 2) // 128) * 128)
        return block
    return block                                           # tiny tensor: 1 step is fine


def locked_dropout(x, key, p=0.5, training=True, locked_dim=0,
                   *, target_block_bytes=2 << 20):
    """LockedDropout forward: the drop pattern is shared along `locked_dim`."""
    if not training or p == 0.0:
        return x
    assert 0.0 <= p < 1.0
    assert jnp.issubdtype(x.dtype, jnp.floating), "LockedDropout needs a floating dtype"

    nd = x.ndim
    locked_dim = locked_dim % nd
    shape = x.shape
    A = int(math.prod(shape[:locked_dim])) if locked_dim > 0 else 1
    L = int(shape[locked_dim])
    B = int(math.prod(shape[locked_dim + 1:])) if locked_dim < nd - 1 else 1

    # Kernel view: contiguous flatten only (no transpose / moveaxis).
    if B > 1:
        xk_shape = (A, L, B)       # locked axis in the middle (sublane axis)
        mk_shape = (A, 1, B)
    else:
        xk_shape = (A, L)          # locked axis is trailing -> keep lanes dense
        mk_shape = (A, 1)
    locked_axis_k = 1
    n_axes = len(xk_shape)
    xk = x.reshape(xk_shape)

    # Build the locked mask once in the wrapper (scale-or-zero, f32).
    # P(keep) = 1 - p, exactly as the PyTorch bernoulli_(1 - p) mask.
    scale = 1.0 / (1.0 - p)
    keep = jax.random.bernoulli(key, 1.0 - p, shape=mk_shape)
    mask = jnp.where(keep, jnp.float32(scale), jnp.float32(0.0))

    sublane_mult = _sublane_multiple(xk.dtype.itemsize)
    xblock = _pick_block(xk_shape, xk.dtype.itemsize, sublane_mult, target_block_bytes)
    xblock = _ensure_multi_step(xk_shape, xblock, sublane_mult)
    xblock = tuple(int(b) for b in xblock)
    mblock = tuple(1 if ax == locked_axis_k else xblock[ax] for ax in range(n_axes))

    grid = tuple(pl.cdiv(xk_shape[ax], xblock[ax]) for ax in range(n_axes))

    def x_index_map(*idx):
        return idx

    def mask_index_map(*idx):
        # Always block 0 along the locked axis -> mask shared ("locked").
        return tuple(0 if ax == locked_axis_k else idx[ax] for ax in range(n_axes))

    out = pl.pallas_call(
        _locked_dropout_kernel,
        out_shape=jax.ShapeDtypeStruct(xk_shape, xk.dtype),
        grid=grid,
        in_specs=[
            pl.BlockSpec(mblock, mask_index_map),     # locked mask (small)
            pl.BlockSpec(xblock, x_index_map),        # payload slab
        ],
        out_specs=pl.BlockSpec(xblock, x_index_map),
        compiler_params=pltpu.CompilerParams(
            dimension_semantics=("parallel",) * n_axes,   # all steps independent
            vmem_limit_bytes=32 * 1024 * 1024),
    )(mask, xk)

    return out.reshape(shape)


if __name__ == "__main__":
    root = jax.random.PRNGKey(0)
    xkey, mkey, m2key, m3key = jax.random.split(root, 4)

    T, Bz, H = 8, 4, 32          # seq=8, batch=4, hidden=32
    p = 0.5
    x = jax.random.normal(xkey, (T, Bz, H), dtype=jnp.float32)

    # --- locked_dim = 0 (classic seq-major variational dropout) ---
    out = jax.block_until_ready(locked_dropout(x, mkey, p=p, training=True, locked_dim=0))
    keep_ref = jax.random.bernoulli(mkey, 1.0 - p, shape=(1, 1, Bz * H))
    mask_ref = jnp.where(keep_ref, jnp.float32(1.0 / (1.0 - p)),
                         jnp.float32(0.0)).reshape(1, Bz, H)
    expected = x * mask_ref
    assert bool(jnp.allclose(out, expected, atol=1e-6, rtol=1e-6)), "locked_dim=0 mismatch"
    n_kept = int(jnp.sum(keep_ref))
    assert 0 < n_kept < Bz * H, "degenerate mask"
    kept = out != 0
    assert bool(jnp.all(kept == kept[0:1])), "mask not locked along dim 0"

    # --- locked_dim = 1 (batch-major layout, middle locked axis) ---
    x2 = jax.random.normal(jax.random.fold_in(xkey, 1), (Bz, T, H), dtype=jnp.float32)
    out2 = jax.block_until_ready(locked_dropout(x2, m2key, p=p, training=True, locked_dim=1))
    keep2 = jax.random.bernoulli(m2key, 1.0 - p, shape=(Bz, 1, H))
    mask2 = jnp.where(keep2, jnp.float32(1.0 / (1.0 - p)), jnp.float32(0.0))
    assert bool(jnp.allclose(out2, x2 * mask2, atol=1e-6, rtol=1e-6)), "locked_dim=1 mismatch"
    kept2 = out2 != 0
    assert bool(jnp.all(kept2 == kept2[:, 0:1, :])), "mask not locked along dim 1"

    # --- locked_dim = 2 (trailing locked axis -> 2-D kernel view) ---
    x3 = jax.random.normal(jax.random.fold_in(xkey, 2), (Bz, T, H), dtype=jnp.float32)
    out3 = jax.block_until_ready(locked_dropout(x3, m3key, p=p, training=True, locked_dim=2))
    keep3 = jax.random.bernoulli(m3key, 1.0 - p, shape=(Bz * T, 1))
    mask3 = jnp.where(keep3, jnp.float32(1.0 / (1.0 - p)),
                      jnp.float32(0.0)).reshape(Bz, T, 1)
    assert bool(jnp.allclose(out3, x3 * mask3, atol=1e-6, rtol=1e-6)), "locked_dim=2 mismatch"
    kept3 = out3 != 0
    assert bool(jnp.all(kept3 == kept3[:, :, 0:1])), "mask not locked along dim 2"

    # --- eval mode / p == 0 are identity ---
    out_eval = locked_dropout(x, mkey, p=p, training=False)
    assert bool(jnp.all(out_eval == x))
    out_p0 = locked_dropout(x, mkey, p=0.0, training=True)
    assert bool(jnp.all(out_p0 == x))

    print("KERNEL_OK")
</pallas_src>

<mosaic_0001>
module attributes {stable_mosaic.version = 11 : i64} {
  func.func @_locked_dropout_kernel(%arg0: i32, %arg1: i32, %arg2: i32, %arg3: memref<1x1x128xf32, #tpu.memory_space<vmem>>, %arg4: memref<1x8x128xf32, #tpu.memory_space<vmem>>, %arg5: memref<1x8x128xf32, #tpu.memory_space<vmem>>) attributes {dimension_semantics = [#tpu.dimension_semantics<parallel>, #tpu.dimension_semantics<parallel>, #tpu.dimension_semantics<parallel>], iteration_bounds = array<i64: 1, 1, 1>, scalar_prefetch = 0 : i64, scratch_operands = 0 : i64, tpu.core_type = #tpu.core_type<tc>, window_params = [{transform_indices = @transform_0, window_bounds = array<i64: 1, 1, 128>}, {transform_indices = @transform_1, window_bounds = array<i64: 1, 8, 128>}, {transform_indices = @transform_2, window_bounds = array<i64: 1, 8, 128>}]} {
    %c0 = arith.constant 0 : index
    %c0_0 = arith.constant 0 : index
    %c0_1 = arith.constant 0 : index
    %0 = vector.load %arg4[%c0, %c0_0, %c0_1] : memref<1x8x128xf32, #tpu.memory_space<vmem>>, vector<1x8x128xf32>
    %c0_2 = arith.constant 0 : index
    %c0_3 = arith.constant 0 : index
    %c0_4 = arith.constant 0 : index
    %1 = vector.load %arg3[%c0_2, %c0_3, %c0_4] : memref<1x1x128xf32, #tpu.memory_space<vmem>>, vector<1x1x128xf32>
    %2 = vector.broadcast %1 : vector<1x1x128xf32> to vector<1x8x128xf32>
    %3 = arith.mulf %0, %2 : vector<1x8x128xf32>
    %c0_5 = arith.constant 0 : index
    %c0_6 = arith.constant 0 : index
    %c0_7 = arith.constant 0 : index
    %4 = vector.load %arg5[%c0_5, %c0_6, %c0_7] : memref<1x8x128xf32, #tpu.memory_space<vmem>>, vector<1x8x128xf32>
    tpu.vector_store %arg5[%c0_5, %c0_6, %c0_7], %3 {strides = array<i32>} : memref<1x8x128xf32, #tpu.memory_space<vmem>>, vector<1x8x128xf32>,
    return
  }
  func.func @transform_0(%arg0: i32, %arg1: i32, %arg2: i32) -> (i32, i32, i32) {
    %c0_i32 = arith.constant 0 : i32
    %c0_i32_0 = arith.constant 0 : i32
    return %arg0, %c0_i32, %arg2 : i32, i32, i32
  }
  func.func @transform_1(%arg0: i32, %arg1: i32, %arg2: i32) -> (i32, i32, i32) {
    %c0_i32 = arith.constant 0 : i32
    return %arg0, %arg1, %arg2 : i32, i32, i32
  }
  func.func @transform_2(%arg0: i32, %arg1: i32, %arg2: i32) -> (i32, i32, i32) {
    %c0_i32 = arith.constant 0 : i32
    return %arg0, %arg1, %arg2 : i32, i32, i32
  }
}

</mosaic_0001>

<bundles_post_ra>
// kernel: tpu_custom_call.1
= control target key start
LH: loop header
LB: loop body
LE: loop exit
PB: predicated region body
PF: predicated region fallthrough
CT: control target
= control target key end

     0   :  { %7 = vsyncpa [#allocation3], 0  ;;  %s159_s0 = inlined_call_operand.hbm [shape: f32[1,1,128], index: 0, kind: input, shape index: {}]   ;;  %s160_s1 = inlined_call_operand.hbm [shape: f32[1,8,128], index: 1, kind: input, shape index: {}]   ;;  %s161_s2 = inlined_call_operand.hbm [shape: f32[1,8,128], index: 2, kind: output, shape index: {}]  }
   0x1   :  { %8 = vsyncpa [#allocation6], 0 }
   0x2   :  { %9 = vsyncpa [#allocation4], 0  ;;  %s132_s9 = smov [#allocation2]   ;;  %s133_s11 = smov [#allocation5]  }
   0x3   :  { %s16_s10 = sshll.u32 %s132_s9, 4  ;;  %s26_s12 = sshll.u32 %s133_s11, 4  ;;  %s17_s10 = int_to_ptr.vmem [resolvable:$true] %s16_s10  ;;  %s27_s12 = int_to_ptr.vmem [resolvable:$true] %s26_s12 }
   0x4   :  { %s74_s13 = scalar_lea.vmem %s17_s10, 16  ;;  %s78_s14 = scalar_lea.vmem %s17_s10, 32 }
   0x5   :  { %p75_p0 = scmp.ne.s32.totalorder %s17_s10, %s74_s13  ;;  %p79_p1 = scmp.lt.s32.totalorder %s17_s10, %s17_s10 }
   0x6   :  { %p80_p2 = scmp.lt.s32.totalorder %s78_s14, %s74_s13 }
   0x8   :  { %p81_p3 = por %p80_p2, %p79_p1 }
   0xa   :  { %p82_p4 = pnand %p81_p3, %p75_p0 }
   0xc   :  { %85 = shalt.err (!%p82_p4)
}
   0xd   :  { %19 = dma.hbm_to_vmem [thread:$0]  %s159_s0, 16, %s17_s10, [#allocation3]  }
   0xe   :  { %s94_s17 = scalar_lea.vmem %s27_s12, 128  ;;  %p99_p6 = scmp.lt.s32.totalorder %s27_s12, %s27_s12 }
   0xf   :  { %p95_p5 = scmp.ne.s32.totalorder %s27_s12, %s94_s17  ;;  %p100_p7 = scmp.lt.s32.totalorder %s94_s17, %s94_s17 }
  0x11   :  { %p101_p8 = por %p100_p7, %p99_p6 }
  0x13   :  { %p102_p9 = pnand %p101_p8, %p95_p5 }
  0x15   :  { %105 = shalt.err (!%p102_p9)
}
  0x16   :  { %29 = dma.hbm_to_vmem [thread:$0]  %s160_s1, 128, %s27_s12, [#allocation6]  }
  0x17   :  { %126 = dma.done.wait [#allocation3], 16  }
  0x18   :  { %127 = vsyncadd [#allocation3], 4294967280 }
  0x19   :  { %128 = dma.done.wait [#allocation6], 128  }
  0x1a   :  { %129 = vsyncadd [#allocation6], 4294967168  ;;  %s134_s20 = smov [#allocation7]   ;;  %v36_v0 = vld [vmem:[#allocation5] sm:$0xff]  ;;  %v62_v1 = vld [vmem:[#allocation2] ss:$0 sm:$0xff] }
  0x1b   :  { %s52_s21 = sshll.u32 %s134_s20, 4  ;;  %v44_v2 = vmul.f32 %v62_v1, %v36_v0  ;;  %s53_s21 = int_to_ptr.vmem [resolvable:$true] %s52_s21 }
  0x1c   :  { %s106_s0 = scalar_lea.vmem %s53_s21, 128  ;;  %p111_p11 = scmp.lt.s32.totalorder %s53_s21, %s53_s21 }
  0x1d   :  { %45 = vst [vmem:[#allocation7] sm:$0xff] %v44_v2  ;;  %p107_p10 = scmp.ne.s32.totalorder %s53_s21, %s106_s0  ;;  %p112_p12 = scmp.lt.s32.totalorder %s106_s0, %s106_s0 }
  0x1f   :  { %p113_p13 = por %p112_p12, %p111_p11 }
  0x21   :  { %p114_p0 = pnand %p113_p13, %p107_p10 }
  0x23   :  { %117 = shalt.err (!%p114_p0)
}
  0x24   :  { %55 = dma.vmem_to_hbm [thread:$0]  %s53_s21, 128, %s161_s2, [#allocation4]  }
  0x25   :  { %130 = dma.done.wait [#allocation4], 128  }
  0x26   :  { %131 = vsyncadd [#allocation4], 4294967168 }
  0x27   :  { %59 = vsyncpa [#allocation3], 1 }
  0x28   :  { %60 = vsyncpa [#allocation6], 1 }
  0x29   :  { %61 = vsyncpa [#allocation4], 1 }

</bundles_post_ra>
